<compile_context>
chip_gen: v7x
topology: tpu7x:2x2x1
jax: 0.10.0
libtpu: 0.0.40
codegen_flags: <defaults>
</compile_context>

<pallas_src>
import functools

import jax
import jax.numpy as jnp
from jax.experimental import pallas as pl
from jax.experimental.pallas import tpu as pltpu


def _round_up(x, m):
    return ((x + m - 1) // m) * m


# ----------------------------------------------------------------------------
# Pallas kernel 1: ConvA|ConvB 1x1-conv chains, pre-collapsed into one GEMM
# ----------------------------------------------------------------------------
def _triplane_conv_kernel(x_ref, w_ref, o_ref):
    # x: (tm, 512) bf16 pixels-x-channels
    # w: (512, 128) bf16 = [w1A@w2A | w1B@w2B]  (chains are linear + bias-free -> exact)
    # o: (tm, 128) bf16 lane-dense output; columns [:64]=ConvA (D,32), [64:]=ConvB (D,32)
    o_ref[...] = jnp.dot(x_ref[...], w_ref[...],
                         preferred_element_type=jnp.float32).astype(jnp.bfloat16)


def triplane_conv(x, wfused, tile_m=1024):
    """x: [P, 512] bf16 (P = N*Hp*Wp pixels). Returns [P_pad, 128] bf16."""
    P, Cin = x.shape
    Cout = wfused.shape[1]
    tile_m = min(tile_m, _round_up(P, 256))          # big tiles at production sizes
    P_pad = _round_up(P, tile_m)
    if P_pad != P:
        x = jnp.pad(x, ((0, P_pad - P), (0, 0)))
    return pl.pallas_call(
        _triplane_conv_kernel,
        out_shape=jax.ShapeDtypeStruct((P_pad, Cout), jnp.bfloat16),
        grid=(pl.cdiv(P_pad, tile_m),),
        in_specs=[
            pl.BlockSpec((tile_m, Cin), lambda i: (i, 0)),
            pl.BlockSpec((Cin, Cout), lambda i: (0, 0)),
        ],
        out_specs=pl.BlockSpec((tile_m, Cout), lambda i: (i, 0)),
        compiler_params=pltpu.CompilerParams(
            dimension_semantics=("parallel",),
            vmem_limit_bytes=32 * 1024 * 1024),
    )(x, wfused)


# ----------------------------------------------------------------------------
# Pallas kernel 2: OSGDecoder MLP fused with the volume-rendering composite
# ----------------------------------------------------------------------------
def _decoder_raymarch_kernel(x_ref, w1_ref, b1_ref, w2_ref, b2_ref, o_ref, *,
                             n_samples, ray_start, ray_end):
    # x:  (S, tr, 64) bf16 -- per-depth-sample [planeA | planeB] features; the mean over the
    #                         two tri-grid planes is folded into w1 (= [0.5*W1; 0.5*W1]).
    # w2/b2 column layout: [:32]=rgb, [32]=sigma, rest zero padding (lane-dense 128 wide).
    # o:  (tr, 128) f32 -- [:32] composited features, [32] depth, [33] acc weight, rest 0.
    S = n_samples
    delta = (ray_end - ray_start) / S
    tr = o_ref.shape[0]
    trans = jnp.ones((tr, 1), jnp.float32)
    feat = jnp.zeros((tr, 32), jnp.float32)
    depth = jnp.zeros((tr, 1), jnp.float32)
    wsum = jnp.zeros((tr, 1), jnp.float32)
    for s in range(S):                                        # static unroll; S is small
        h = jnp.dot(x_ref[s], w1_ref[...],
                    preferred_element_type=jnp.float32) + b1_ref[...]
        h = jax.nn.softplus(h).astype(jnp.bfloat16)
        o = jnp.dot(h, w2_ref[...],
                    preferred_element_type=jnp.float32) + b2_ref[...]
        # sigmoid via exp + approx reciprocal (EUP is the binding unit of this kernel)
        rgb = pl.reciprocal(1.0 + jnp.exp(-o[:, :32]), approx=True) \
            * (1.0 + 2 * 0.001) - 0.001
        sigma = o[:, 32:33]
        # TODO(synk): MipRayMarcher2 midpoint integration / importance resampling not
        # reproduced; uniform-step emission-absorption composite stand-in.
        density = jax.nn.softplus(sigma - 1.0)
        alpha = 1.0 - jnp.exp(-density * delta)
        w_s = alpha * trans
        t_s = ray_start + (ray_end - ray_start) * (s + 0.5) / S
        feat = feat + w_s * rgb
        depth = depth + w_s * t_s
        wsum = wsum + w_s
        trans = trans * (1.0 - alpha + 1e-10)
    pad = jnp.zeros((tr, 128 - 34), jnp.float32)
    o_ref[...] = jnp.concatenate([feat, depth, wsum, pad], axis=-1)


def decoder_raymarch(feat_svd, w1f, b1, w2p, b2p, *, ray_start, ray_end, tile_r=512):
    """feat_svd: [S, R, 64] bf16 (R rays, S depth samples per ray, [A|B] features).

    Returns [R_pad, 128] f32: [:32]=composited rgb features, [32]=depth, [33]=acc weight.
    """
    S, R, K = feat_svd.shape
    Hd = w1f.shape[1]
    Op = w2p.shape[1]
    tile_r = min(tile_r, _round_up(R, 64))
    R_pad = _round_up(R, tile_r)
    if R_pad != R:
        feat_svd = jnp.pad(feat_svd, ((0, 0), (0, R_pad - R), (0, 0)))
    kernel = functools.partial(_decoder_raymarch_kernel, n_samples=S,
                               ray_start=ray_start, ray_end=ray_end)
    return pl.pallas_call(
        kernel,
        out_shape=jax.ShapeDtypeStruct((R_pad, Op), jnp.float32),
        grid=(pl.cdiv(R_pad, tile_r),),
        in_specs=[
            pl.BlockSpec((S, tile_r, K), lambda i: (0, i, 0)),
            pl.BlockSpec((K, Hd), lambda i: (0, 0)),
            pl.BlockSpec((1, Hd), lambda i: (0, 0)),
            pl.BlockSpec((Hd, Op), lambda i: (0, 0)),
            pl.BlockSpec((1, Op), lambda i: (0, 0)),
        ],
        out_specs=pl.BlockSpec((tile_r, Op), lambda i: (i, 0)),
        compiler_params=pltpu.CompilerParams(
            dimension_semantics=("parallel",),
            vmem_limit_bytes=32 * 1024 * 1024),
    )(feat_svd, w1f, b1, w2p, b2p)


# ----------------------------------------------------------------------------
# Plain-JAX glue (shape-faithful stand-ins for undefined submodules)
# ----------------------------------------------------------------------------
def ray_sampler(cam2world, intrinsics, resolution):
    # TODO(synk): exact EG3D RaySampler uv convention not available; standard pinhole rays.
    fx, fy = intrinsics[:, 0, 0], intrinsics[:, 1, 1]
    cx, cy = intrinsics[:, 0, 2], intrinsics[:, 1, 2]
    u = (jnp.arange(resolution, dtype=jnp.float32) + 0.5) / resolution
    uu, vv = jnp.meshgrid(u, u, indexing="xy")
    uv = jnp.stack([uu.reshape(-1), vv.reshape(-1)], axis=-1)            # [M, 2]
    x = (uv[None, :, 0] - cx[:, None]) / fx[:, None]
    y = (uv[None, :, 1] - cy[:, None]) / fy[:, None]
    z = jnp.ones_like(x)
    dirs_cam = jnp.stack([x, y, z], axis=-1)
    dirs_cam = dirs_cam / jnp.linalg.norm(dirs_cam, axis=-1, keepdims=True)
    dirs_world = jnp.einsum("nij,nmj->nmi", cam2world[:, :3, :3], dirs_cam)
    origins = jnp.broadcast_to(cam2world[:, None, :3, 3], dirs_world.shape)
    return origins, dirs_world


def init_params(key, z_dim, w_dim, triplane_size, triplane_depth):
    # Equalized-lr runtime gains are folded into the deterministic synthetic weights; all
    # kernel weights are stored pre-transposed (in, out), pre-fused and pre-padded so the
    # hot path issues no transposes / concats.
    ks = jax.random.split(key, 9)
    c_out = 32 * triplane_depth                                  # 64 per branch

    # ConvA / ConvB: each = two bias-free activation='linear' 1x1 convs -> collapse the
    # chain offline into a single (512, 2*c_out) fused weight.
    w1A = jax.random.normal(ks[3], (512, 256), jnp.float32) / jnp.sqrt(512.0)
    w1B = jax.random.normal(ks[4], (512, 256), jnp.float32) / jnp.sqrt(512.0)
    w2A = jax.random.normal(ks[5], (256, c_out), jnp.float32) / jnp.sqrt(256.0)
    w2B = jax.random.normal(ks[6], (256, c_out), jnp.float32) / jnp.sqrt(256.0)
    conv_wfused = jnp.concatenate([w1A @ w2A, w1B @ w2B], axis=1)        # (512, 128)

    # OSGDecoder: plane-mean folded into FC1; FC2 output reordered to [rgb(32) | sigma(1)]
    # and zero-padded to 128 lane-dense columns.
    dec_w1 = jax.random.normal(ks[7], (32, 64), jnp.float32) / jnp.sqrt(32.0)
    dec_w2 = jax.random.normal(ks[8], (64, 33), jnp.float32) / jnp.sqrt(64.0)
    dec_w1f = jnp.concatenate([0.5 * dec_w1, 0.5 * dec_w1], axis=0)      # (64, 64)
    dec_w2p = jnp.zeros((64, 128), jnp.float32)
    dec_w2p = dec_w2p.at[:, :32].set(dec_w2[:, 1:33]).at[:, 32].set(dec_w2[:, 0])

    return {
        "map_w": jax.random.normal(ks[0], (z_dim, w_dim), jnp.float32) / jnp.sqrt(float(z_dim)),
        "t_map_w": jax.random.normal(ks[1], (z_dim, 3), jnp.float32) * 0.01,
        # synthetic backbone planes kept channel-last (Hp, Wp, 512)
        "plane_base": jax.random.normal(
            ks[2], (triplane_size, triplane_size, 512), jnp.float32) * 0.1,
        "conv_wfused": conv_wfused.astype(jnp.bfloat16),
        "dec_w1f": dec_w1f.astype(jnp.bfloat16),
        "dec_b1": jnp.zeros((1, 64), jnp.float32),
        "dec_w2p": dec_w2p.astype(jnp.bfloat16),
        "dec_b2p": jnp.zeros((1, 128), jnp.float32),
    }


def triplane_generator_forward(params, z, c, *, neural_rendering_resolution=8,
                               triplane_depth=2, depth_samples=4, img_resolution=32,
                               ray_start=2.25, ray_end=3.3, box_warp=1.6):
    N = z.shape[0]
    D = triplane_depth

    # ---- mapping (c_gen_conditioning_zero=True, c_scale=0 -> conditioning is zero) ----
    # TODO(synk): full StyleGAN2 MappingNetwork (8-layer MLP, w_avg truncation) not reproduced.
    w = jnp.tanh(z @ params["map_w"])                          # [N, w_dim]

    # ---- apply_delta_c ----
    delta_c = z @ params["t_map_w"]                            # [N, 3]
    c = c.at[:, 3].add(delta_c[:, 0]).at[:, 7].add(delta_c[:, 1]).at[:, 11].add(delta_c[:, 2])

    # ---- ray sampler ----
    cam2world = c[:, :16].reshape(N, 4, 4)
    intrinsics = c[:, 16:25].reshape(N, 3, 3)
    ray_origins, ray_directions = ray_sampler(cam2world, intrinsics, neural_rendering_resolution)
    M = ray_origins.shape[1]

    # ---- backbone.synthesis ----
    # TODO(synk): StyleGAN2Backbone synthesis network not reproduced; ws-modulated synthetic
    # planes kept channel-last so the conv kernel needs no NCHW->NHWC transpose.
    s = w.mean(-1)
    planes_nhwc = params["plane_base"][None] * (1.0 + 0.1 * s[:, None, None, None])
    Hp, Wp = planes_nhwc.shape[1], planes_nhwc.shape[2]

    # ---- ConvA + ConvB (single pre-collapsed GEMM, Pallas, bf16 lane-dense output) ----
    x_rows = planes_nhwc.reshape(N * Hp * Wp, 512).astype(jnp.bfloat16)
    conv_out = triplane_conv(x_rows, params["conv_wfused"])    # [P_pad, 128] bf16
    # column layout = (plane{A,B}, depth D, channel 32), matching torch's
    # ConvX(planes).view(N, 1, D, 32, H, W).

    # ---- renderer: uniform depth sampling + tri-grid feature lookup ----
    S = depth_samples
    t = ray_start + (ray_end - ray_start) * (jnp.arange(S, dtype=jnp.float32) + 0.5) / S
    coords = ray_origins[:, :, None, :] + ray_directions[:, :, None, :] * t[None, None, :, None]
    coords_n = (2.0 * coords / box_warp).reshape(N, M * S, 3)  # normalize to ~[-1, 1]

    # TODO(synk): ImportanceRenderer bilinear grid_sample / importance resampling not
    # reproduced; nearest-neighbor gather directly from the kernel's lane-dense (P,128)
    # output (no planes6 stack / 6-D transpose materialization).
    def to_idx(u, n):
        return jnp.clip(jnp.round((u + 1.0) * 0.5 * (n - 1)).astype(jnp.int32), 0, n - 1)

    ix = to_idx(coords_n[..., 0], Wp)
    iy = to_idx(coords_n[..., 1], Hp)
    iz = to_idx(coords_n[..., 2], D)
    flat = jnp.arange(N, dtype=jnp.int32)[:, None] * (Hp * Wp) + iy * Wp + ix    # [N, M*S]
    rows = conv_out[flat]                                      # [N, M*S, 128] bf16
    rows = rows.reshape(N, M * S, 2, D, 32)
    feats = jnp.take_along_axis(rows, iz[:, :, None, None, None], axis=3)[:, :, :, 0, :]
    # [N, M*S, 2, 32] -> sample-major (S, rays, [A|B]) layout for the fused decoder
    feat_svd = feats.reshape(N, M, S, 2 * 32).transpose(2, 0, 1, 3)
    feat_svd = feat_svd.reshape(S, N * M, 2 * 32).astype(jnp.bfloat16)

    # ---- OSGDecoder MLP + volume-render composite (fused Pallas kernel) ----
    dec = decoder_raymarch(feat_svd, params["dec_w1f"], params["dec_b1"],
                           params["dec_w2p"], params["dec_b2p"],
                           ray_start=ray_start, ray_end=ray_end)   # [R_pad, 128] f32
    dec = dec[:N * M]
    feature_samples = dec[:, :32].reshape(N, M, 32)
    depth_samples_out = dec[:, 32:33].reshape(N, M, 1)
    weights_samples = dec[:, 33:34].reshape(N, M, 1)

    # ---- image assembly ----
    H = W = neural_rendering_resolution
    feature_image = feature_samples.transpose(0, 2, 1).reshape(N, 32, H, W)
    depth_image = depth_samples_out.transpose(0, 2, 1).reshape(N, 1, H, W)
    weights_img = weights_samples.transpose(0, 2, 1).reshape(N, 1, H, W)

    # decoder activation == 'sigmoid' -> feature_image * 2 - 1
    # (tiny elementwise op; left to XLA fusion -- a pallas_call here is pure overhead)
    feature_image = feature_image * 2.0 - 1.0
    rgb_image = feature_image[:, :3]

    # TODO(synk): superresolution module (rendering_kwargs['superresolution_module']) not
    # reproduced; bilinear upsample stand-in.
    sr_image = jax.image.resize(rgb_image, (N, 3, img_resolution, img_resolution),
                                method="bilinear")

    mask_image = weights_img * (1.0 + 2 * 0.001) - 0.001

    # TODO(synk): use_background / torgb_raw / parsing branches are disabled in this config.
    return {"image": sr_image, "image_raw": rgb_image,
            "image_depth": depth_image, "image_mask": mask_image}


# ----------------------------------------------------------------------------
# Main
# ----------------------------------------------------------------------------
if __name__ == "__main__":
    key = jax.random.PRNGKey(0)
    k_param, k_z = jax.random.split(key)

    Z_DIM, C_DIM, W_DIM = 32, 25, 32
    TRIPLANE_SIZE, TRIPLANE_DEPTH = 16, 2
    IMG_RESOLUTION = 32
    NRR = 8        # neural rendering resolution -> M = 64 rays per image
    N = 2

    params = init_params(k_param, Z_DIM, W_DIM, TRIPLANE_SIZE, TRIPLANE_DEPTH)

    z = jax.random.normal(k_z, (N, Z_DIM), jnp.float32)

    def make_c(tx):
        c2w = jnp.eye(4, dtype=jnp.float32).at[0, 3].set(tx).at[2, 3].set(2.7)
        K = jnp.array([[4.26, 0.0, 0.5], [0.0, 4.26, 0.5], [0.0, 0.0, 1.0]], jnp.float32)
        return jnp.concatenate([c2w.reshape(-1), K.reshape(-1)])

    c = jnp.stack([make_c(0.0), make_c(0.1)])     # [2, 25]

    out = triplane_generator_forward(
        params, z, c,
        neural_rendering_resolution=NRR,
        triplane_depth=TRIPLANE_DEPTH,
        depth_samples=4,
        img_resolution=IMG_RESOLUTION,
    )
    jax.block_until_ready(out)

    assert out["image"].shape == (N, 3, IMG_RESOLUTION, IMG_RESOLUTION)
    assert out["image_raw"].shape == (N, 3, NRR, NRR)
    assert out["image_depth"].shape == (N, 1, NRR, NRR)
    assert out["image_mask"].shape == (N, 1, NRR, NRR)
    print("KERNEL_OK")
</pallas_src>

<mosaic_0001>
module attributes {stable_mosaic.version = 11 : i64} {
  func.func @_triplane_conv_kernel(%arg0: i32, %arg1: memref<512x512xbf16, #tpu.memory_space<vmem>>, %arg2: memref<512x128xbf16, #tpu.memory_space<vmem>>, %arg3: memref<512x128xbf16, #tpu.memory_space<vmem>>) attributes {dimension_semantics = [#tpu.dimension_semantics<parallel>], iteration_bounds = array<i64: 1>, scalar_prefetch = 0 : i64, scratch_operands = 0 : i64, tpu.core_type = #tpu.core_type<tc>, window_params = [{transform_indices = @transform_0, window_bounds = array<i64: 512, 512>}, {pipeline_mode = #tpu.pipeline_mode<synchronous>, transform_indices = @transform_1, window_bounds = array<i64: 512, 128>}, {transform_indices = @transform_2, window_bounds = array<i64: 512, 128>}]} {
    %c0 = arith.constant 0 : index
    %c0_0 = arith.constant 0 : index
    %0 = vector.load %arg1[%c0, %c0_0] : memref<512x512xbf16, #tpu.memory_space<vmem>>, vector<512x512xbf16>
    %c0_1 = arith.constant 0 : index
    %c0_2 = arith.constant 0 : index
    %1 = vector.load %arg2[%c0_1, %c0_2] : memref<512x128xbf16, #tpu.memory_space<vmem>>, vector<512x128xbf16>
    %cst = arith.constant dense<0.000000e+00> : vector<512x128xf32>
    %2 = tpu.matmul %0, %1, %cst {dimension_numbers = #tpu.dot_dimension_numbers<[1], [0], [0], [1], [0, 0, 1, 1], [], []>} : vector<512x512xbf16>, vector<512x128xbf16>, vector<512x128xf32> -> vector<512x128xf32>
    %3 = arith.truncf %2 : vector<512x128xf32> to vector<512x128xbf16>
    %c0_3 = arith.constant 0 : index
    %c0_4 = arith.constant 0 : index
    %4 = vector.load %arg3[%c0_3, %c0_4] : memref<512x128xbf16, #tpu.memory_space<vmem>>, vector<512x128xbf16>
    tpu.vector_store %arg3[%c0_3, %c0_4], %3 {strides = array<i32>} : memref<512x128xbf16, #tpu.memory_space<vmem>>, vector<512x128xbf16>,
    return
  }
  func.func @transform_0(%arg0: i32) -> (i32, i32) {
    %c0_i32 = arith.constant 0 : i32
    %c0_i32_0 = arith.constant 0 : i32
    return %arg0, %c0_i32 : i32, i32
  }
  func.func @transform_1(%arg0: i32) -> (i32, i32) {
    %c0_i32 = arith.constant 0 : i32
    %c0_i32_0 = arith.constant 0 : i32
    %c0_i32_1 = arith.constant 0 : i32
    return %c0_i32, %c0_i32_0 : i32, i32
  }
  func.func @transform_2(%arg0: i32) -> (i32, i32) {
    %c0_i32 = arith.constant 0 : i32
    %c0_i32_0 = arith.constant 0 : i32
    return %arg0, %c0_i32 : i32, i32
  }
}

</mosaic_0001>

<bundles_post_ra>
// kernel: tpu_custom_call.1
= control target key start
LH: loop header
LB: loop body
LE: loop exit
PB: predicated region body
PF: predicated region fallthrough
CT: control target
= control target key end

     0   :  { %7 = vsyncpa [#allocation3], 0  ;;  %s2925_s0 = inlined_call_operand.hbm [shape: bf16[512,512], index: 0, kind: input, shape index: {}]   ;;  %s2926_s1 = inlined_call_operand.hbm [shape: bf16[512,128], index: 1, kind: input, shape index: {}]   ;;  %s2927_s2 = inlined_call_operand.hbm [shape: bf16[512,128], index: 2, kind: output, shape index: {}]  }
   0x1   :  { %8 = vsyncpa [#allocation6], 0 }
   0x2   :  { %9 = vsyncpa [#allocation4], 0  ;;  %s2828_s9 = smov [#allocation2]   ;;  %s2756_s13 = scalar_lea.hbm %s2925_s0, 16384 }
   0x3   :  { %s15_s10 = sshll.u32 %s2828_s9, 4  ;;  %p2757_p0 = scmp.ne.s32.totalorder %s2925_s0, %s2756_s13  ;;  %s16_s10 = int_to_ptr.vmem [resolvable:$true] %s15_s10 }
   0x4   :  { %p2760_p1 = scmp.lt.u32.totalorder %s2756_s13, %s2925_s0 }
   0x6   :  { %p2762_p2 = pnand %p2760_p1, %p2757_p0 }
   0x8   :  { %2765 = shalt.err (!%p2762_p2)
}
   0x9   :  { %s2766_s18 = scalar_lea.vmem %s16_s10, 16384  ;;  %p2771_p4 = scmp.lt.s32.totalorder %s16_s10, %s16_s10 }
   0xa   :  { %p2767_p3 = scmp.ne.s32.totalorder %s16_s10, %s2766_s18  ;;  %p2772_p5 = scmp.lt.s32.totalorder %s2766_s18, %s2766_s18 }
   0xc   :  { %p2773_p6 = por %p2772_p5, %p2771_p4 }
   0xe   :  { %p2774_p7 = pnand %p2773_p6, %p2767_p3 }
  0x10   :  { %2777 = shalt.err (!%p2774_p7)
}
  0x11   :  { %s2829_s19 = smov 256   ;;  %s2830_s20 = smov 16  }
  0x12   :  { %21 = dma.hbm_to_vmem [thread:$0]  %s2925_s0, 16384, %s16_s10, [#allocation3], %s2829_s19, %s2829_s19, %s2830_s20  }
  0x13   :  { %s2831_s23 = smov [#allocation5]   ;;  %s2778_s27 = scalar_lea.hbm %s2926_s1, 4096 }
  0x14   :  { %s27_s24 = sshll.u32 %s2831_s23, 4  ;;  %p2779_p8 = scmp.ne.s32.totalorder %s2926_s1, %s2778_s27  ;;  %s28_s24 = int_to_ptr.vmem [resolvable:$true] %s27_s24 }
  0x15   :  { %p2782_p9 = scmp.lt.u32.totalorder %s2778_s27, %s2926_s1 }
  0x17   :  { %p2784_p10 = pnand %p2782_p9, %p2779_p8 }
  0x19   :  { %2787 = shalt.err (!%p2784_p10)
}
  0x1a   :  { %s2788_s4 = scalar_lea.vmem %s28_s24, 4096  ;;  %p2793_p12 = scmp.lt.s32.totalorder %s28_s24, %s28_s24 }
  0x1b   :  { %p2789_p11 = scmp.ne.s32.totalorder %s28_s24, %s2788_s4  ;;  %p2794_p13 = scmp.lt.s32.totalorder %s2788_s4, %s2788_s4 }
  0x1d   :  { %p2795_p0 = por %p2794_p13, %p2793_p12 }
  0x1f   :  { %p2796_p1 = pnand %p2795_p0, %p2789_p11 }
  0x21   :  { %2799 = shalt.err (!%p2796_p1)
}
  0x22   :  { %s2832_s0 = smov 64   ;;  %s2833_s5 = smov 4  }
  0x23   :  { %33 = dma.hbm_to_vmem [thread:$0]  %s2926_s1, 4096, %s28_s24, [#allocation6], %s2832_s0, %s2832_s0, %s2833_s5  }
  0x24   :  { %2822 = dma.done.wait [#allocation3], 16384  }
  0x25   :  { %2823 = vsyncadd [#allocation3], 4294950912 }
  0x26   :  { %2824 = dma.done.wait [#allocation6], 4096  }
  0x27   :  { %2825 = vsyncadd [#allocation6], 4294963200  ;;  %v2834_v0 = vmov 0   ;;  %v2532_v1 = vld [vmem:[#allocation5] sm:$0xff]   ;;  %v2534_v3 = vld [vmem:[#allocation5 + $0x8] sm:$0xff]   ;;  %s2835_s1 = smov [#allocation7]  }
  0x28   :  { %1065 = vmatprep.subr.bf16.mxu1 %v2834_v0  ;;  %1354 = vmatprep.subr.bf16.mxu0 %v2834_v0  ;;  %v2533_v2 = vld [vmem:[#allocation5 + $0x80] sm:$0xff]   ;;  %v2535_v4 = vld [vmem:[#allocation5 + $0x88] sm:$0xff]   ;;  %v2536_v5 = vld [vmem:[#allocation5 + $0x10] sm:$0xff]   ;;  %s1968_s8 = sshll.u32 %s2835_s1, 4  ;;  %s1969_s8 = int_to_ptr.vmem [resolvable:$true] %s1968_s8 }
  0x29   :  { %1066 = vmatpush1.bf16.msra.mxu1 %v2532_v1  ;;  %1355 = vmatpush1.bf16.msra.mxu0 %v2533_v2  ;;  %v2537_v6 = vld [vmem:[#allocation5 + $0x90] sm:$0xff]   ;;  %v2538_v7 = vld [vmem:[#allocation5 + $0x18] sm:$0xff]   ;;  %v2540_v9 = vld [vmem:[#allocation5 + $0x20] sm:$0xff]   ;;  %s2800_s9 = scalar_lea.vmem %s1969_s8, 4096  ;;  %p2805_p3 = scmp.lt.s32.totalorder %s1969_s8, %s1969_s8 }
  0x2a   :  { %1067 = vmatprep.subr.bf16.mxu1 %v2834_v0  ;;  %1356 = vmatprep.subr.bf16.mxu0 %v2834_v0  ;;  %v2539_v8 = vld [vmem:[#allocation5 + $0x98] sm:$0xff]   ;;  %v2541_v10 = vld [vmem:[#allocation5 + $0xa0] sm:$0xff]   ;;  %v2542_v11 = vld [vmem:[#allocation5 + $0x28] sm:$0xff]   ;;  %p2801_p2 = scmp.ne.s32.totalorder %s1969_s8, %s2800_s9  ;;  %p2806_p4 = scmp.lt.s32.totalorder %s2800_s9, %s2800_s9 }
  0x2b   :  { %v2543_v12 = vld [vmem:[#allocation5 + $0xa8] sm:$0xff]   ;;  %v2544_v13 = vld [vmem:[#allocation5 + $0x30] sm:$0xff]   ;;  %v2546_v15 = vld [vmem:[#allocation5 + $0x38] sm:$0xff]  }
  0x2c   :  { %v2545_v14 = vld [vmem:[#allocation5 + $0xb0] sm:$0xff]   ;;  %v2547_v16 = vld [vmem:[#allocation5 + $0xb8] sm:$0xff]   ;;  %v2548_v17 = vld [vmem:[#allocation5 + $0x40] sm:$0xff]   ;;  %p2807_p5 = por %p2806_p4, %p2805_p3 }
  0x2d   :  { %1068 = vmatpush1.bf16.msra.mxu1 %v2534_v3  ;;  %1357 = vmatpush1.bf16.msra.mxu0 %v2535_v4  ;;  %v2549_v18 = vld [vmem:[#allocation5 + $0xc0] sm:$0xff]   ;;  %v2550_v20 = vld [vmem:[#allocation5 + $0x48] sm:$0xff]   ;;  %v2552_v23 = vld [vmem:[#allocation5 + $0x50] sm:$0xff]  }
  0x2e   :  { %1069 = vmatprep.subr.bf16.mxu1 %v2834_v0  ;;  %1358 = vmatprep.subr.bf16.mxu0 %v2834_v0  ;;  %v2566_v19 = vld [vmem:[#allocation2 + $0x4] ss:$16 sps:$4 sm:$0xff]   ;;  %v2569_v21 = vld [vmem:[#allocation2 + $0xc] ss:$16 sps:$4 sm:$0xff]   ;;  %v2564_v35 = vld [vmem:[#allocation2] ss:$16 sps:$4 sm:$0xff]   ;;  %p2808_p6 = pnand %p2807_p5, %p2801_p2 }
  0x2f   :  { %v2551_v22 = vld [vmem:[#allocation5 + $0xc8] sm:$0xff]   ;;  %1097 = vmatprep.mubr.bf16.mxu1 %v2566_v19  ;;  %1386 = vmatprep.mubr.bf16.mxu0 %v2569_v21  ;;  %v2553_v24 = vld [vmem:[#allocation5 + $0xd0] sm:$0xff]   ;;  %v2554_v25 = vld [vmem:[#allocation5 + $0x58] sm:$0xff]  }
  0x30   :  { %v2555_v26 = vld [vmem:[#allocation5 + $0xd8] sm:$0xff]   ;;  %v2556_v27 = vld [vmem:[#allocation5 + $0x60] sm:$0xff]   ;;  %v2558_v29 = vld [vmem:[#allocation5 + $0x68] sm:$0xff]  }
  0x31   :  { %1070 = vmatpush1.bf16.msra.mxu1 %v2536_v5  ;;  %1359 = vmatpush1.bf16.msra.mxu0 %v2537_v6  ;;  %v2557_v28 = vld [vmem:[#allocation5 + $0xe0] sm:$0xff]   ;;  %v2559_v30 = vld [vmem:[#allocation5 + $0xe8] sm:$0xff]   ;;  %v2560_v31 = vld [vmem:[#allocation5 + $0x70] sm:$0xff]  }
  0x32   :  { %1071 = vmatprep.subr.bf16.mxu1 %v2834_v0  ;;  %1360 = vmatprep.subr.bf16.mxu0 %v2834_v0  ;;  %v2561_v32 = vld [vmem:[#allocation5 + $0xf0] sm:$0xff]   ;;  %v2562_v33 = vld [vmem:[#allocation5 + $0x78] sm:$0xff]  }
  0x33   :  { %v2563_v34 = vld [vmem:[#allocation5 + $0xf8] sm:$0xff]   ;;  %v2570_v37 = vld [vmem:[#allocation2 + $0x24] ss:$16 sps:$4 sm:$0xff]   ;;  %v2574_v39 = vld [vmem:[#allocation2 + $0x20] ss:$16 sps:$4 sm:$0xff]  }
  0x34   :  { %v2567_v36 = vld [vmem:[#allocation2 + $0x8] ss:$16 sps:$4 sm:$0xff]   ;;  %v2572_v38 = vld [vmem:[#allocation2 + $0x2c] ss:$16 sps:$4 sm:$0xff]   ;;  %v2576_v41 = vld [vmem:[#allocation2 + $0x44] ss:$16 sps:$4 sm:$0xff]  }
  0x35   :  { %1072 = vmatpush1.bf16.msra.mxu1 %v2538_v7  ;;  %1361 = vmatpush1.bf16.msra.mxu0 %v2539_v8  ;;  %v2575_v40 = vld [vmem:[#allocation2 + $0x28] ss:$16 sps:$4 sm:$0xff]   ;;  %v2578_v42 = vld [vmem:[#allocation2 + $0x4c] ss:$16 sps:$4 sm:$0xff]   ;;  %v2580_v43 = vld [vmem:[#allocation2 + $0x40] ss:$16 sps:$4 sm:$0xff]  }
  0x36   :  { %1073 = vmatprep.subr.bf16.mxu1 %v2834_v0  ;;  %1362 = vmatprep.subr.bf16.mxu0 %v2834_v0  ;;  %v2581_v44 = vld [vmem:[#allocation2 + $0x48] ss:$16 sps:$4 sm:$0xff]   ;;  %v2582_v45 = vld [vmem:[#allocation2 + $0x64] ss:$16 sps:$4 sm:$0xff]   ;;  %v2584_v46 = vld [vmem:[#allocation2 + $0x6c] ss:$16 sps:$4 sm:$0xff]  }
  0x37   :  { %v2586_v47 = vld [vmem:[#allocation2 + $0x60] ss:$16 sps:$4 sm:$0xff]   ;;  %v2587_v48 = vld [vmem:[#allocation2 + $0x68] ss:$16 sps:$4 sm:$0xff]   ;;  %v2588_v49 = vld [vmem:[#allocation2 + $0x84] ss:$16 sps:$4 sm:$0xff]  }
  0x38   :  { %v2590_v50 = vld [vmem:[#allocation2 + $0x8c] ss:$16 sps:$4 sm:$0xff]   ;;  %v2592_v51 = vld [vmem:[#allocation2 + $0x80] ss:$16 sps:$4 sm:$0xff]   ;;  %v2593_v52 = vld [vmem:[#allocation2 + $0x88] ss:$16 sps:$4 sm:$0xff]  }
  0x39   :  { %1074 = vmatpush1.bf16.msra.mxu1 %v2540_v9  ;;  %1363 = vmatpush1.bf16.msra.mxu0 %v2541_v10  ;;  %v2594_v53 = vld [vmem:[#allocation2 + $0xa4] ss:$16 sps:$4 sm:$0xff]   ;;  %v2596_v54 = vld [vmem:[#allocation2 + $0xac] ss:$16 sps:$4 sm:$0xff]   ;;  %v2598_v55 = vld [vmem:[#allocation2 + $0xa0] ss:$16 sps:$4 sm:$0xff]  }
  0x3a   :  { %1075 = vmatprep.subr.bf16.mxu1 %v2834_v0  ;;  %1364 = vmatprep.subr.bf16.mxu0 %v2834_v0  ;;  %v2599_v56 = vld [vmem:[#allocation2 + $0xa8] ss:$16 sps:$4 sm:$0xff]   ;;  %v2600_v57 = vld [vmem:[#allocation2 + $0xc4] ss:$16 sps:$4 sm:$0xff]   ;;  %v2602_v58 = vld [vmem:[#allocation2 + $0xcc] ss:$16 sps:$4 sm:$0xff]  }
  0x3b   :  { %v2604_v59 = vld [vmem:[#allocation2 + $0xc0] ss:$16 sps:$4 sm:$0xff]   ;;  %v2605_v60 = vld [vmem:[#allocation2 + $0xc8] ss:$16 sps:$4 sm:$0xff]   ;;  %v2606_v61 = vld [vmem:[#allocation2 + $0xe4] ss:$16 sps:$4 sm:$0xff]  }
  0x3c   :  { %v2608_v62 = vld [vmem:[#allocation2 + $0xec] ss:$16 sps:$4 sm:$0xff]   ;;  %v2610_v63 = vld [vmem:[#allocation2 + $0xe0] ss:$16 sps:$4 sm:$0xff]   ;;  %v2612_v1 = vld [vmem:[#allocation2 + $0x104] ss:$16 sps:$4 sm:$0xff]  }
  0x3d   :  { %1076 = vmatpush1.bf16.msra.mxu1 %v2542_v11  ;;  %1365 = vmatpush1.bf16.msra.mxu0 %v2543_v12  ;;  %v2614_v2 = vld [vmem:[#allocation2 + $0x10c] ss:$16 sps:$4 sm:$0xff]   ;;  %v2616_v3 = vld [vmem:[#allocation2 + $0x100] ss:$16 sps:$4 sm:$0xff]   ;;  %v2617_v4 = vld [vmem:[#allocation2 + $0x108] ss:$16 sps:$4 sm:$0xff]  }
  0x3e   :  { %1077 = vmatprep.subr.bf16.mxu1 %v2834_v0  ;;  %1366 = vmatprep.subr.bf16.mxu0 %v2834_v0  ;;  %v2618_v5 = vld [vmem:[#allocation2 + $0x124] ss:$16 sps:$4 sm:$0xff]   ;;  %v2620_v6 = vld [vmem:[#allocation2 + $0x12c] ss:$16 sps:$4 sm:$0xff]   ;;  %v2622_v7 = vld [vmem:[#allocation2 + $0x120] ss:$16 sps:$4 sm:$0xff]  }
  0x3f   :  { %v2623_v8 = vld [vmem:[#allocation2 + $0x128] ss:$16 sps:$4 sm:$0xff]   ;;  %v2624_v9 = vld [vmem:[#allocation2 + $0x144] ss:$16 sps:$4 sm:$0xff]   ;;  %v2626_v10 = vld [vmem:[#allocation2 + $0x14c] ss:$16 sps:$4 sm:$0xff]  }
  0x40   :  { %v2628_v11 = vld [vmem:[#allocation2 + $0x140] ss:$16 sps:$4 sm:$0xff]   ;;  %v2629_v12 = vld [vmem:[#allocation2 + $0x148] ss:$16 sps:$4 sm:$0xff]   ;;  %v2642_v21 = vld [vmem:[#allocation2 + $0x1a4] ss:$16 sps:$4 sm:$0xff]  }
  0x41   :  { %1078 = vmatpush1.bf16.msra.mxu1 %v2544_v13  ;;  %1367 = vmatpush1.bf16.msra.mxu0 %v2545_v14  ;;  %v2630_v13 = vld [vmem:[#allocation2 + $0x164] ss:$16 sps:$4 sm:$0xff]   ;;  %v2632_v14 = vld [vmem:[#allocation2 + $0x16c] ss:$16 sps:$4 sm:$0xff]   ;;  %v2640_v19 = vld [vmem:[#allocation2 + $0x180] ss:$16 sps:$4 sm:$0xff]  }
  0x42   :  { %1079 = vmatprep.subr.bf16.mxu1 %v2834_v0  ;;  %1368 = vmatprep.subr.bf16.mxu0 %v2834_v0 }
  0x45   :  { %1080 = vmatpush1.bf16.msra.mxu1 %v2546_v15  ;;  %1369 = vmatpush1.bf16.msra.mxu0 %v2547_v16  ;;  %v2634_v15 = vld [vmem:[#allocation2 + $0x160] ss:$16 sps:$4 sm:$0xff]   ;;  %v2635_v16 = vld [vmem:[#allocation2 + $0x168] ss:$16 sps:$4 sm:$0xff]  }
  0x46   :  { %1081 = vmatprep.subr.bf16.mxu1 %v2834_v0  ;;  %1370 = vmatprep.subr.bf16.mxu0 %v2834_v0 }
  0x49   :  { %1082 = vmatpush1.bf16.msra.mxu1 %v2548_v17  ;;  %1371 = vmatpush1.bf16.msra.mxu0 %v2549_v18  ;;  %v2636_v17 = vld [vmem:[#allocation2 + $0x184] ss:$16 sps:$4 sm:$0xff]   ;;  %v2638_v18 = vld [vmem:[#allocation2 + $0x18c] ss:$16 sps:$4 sm:$0xff]  }
  0x4a   :  { %1083 = vmatprep.subr.bf16.mxu1 %v2834_v0  ;;  %1372 = vmatprep.subr.bf16.mxu0 %v2834_v0 }
  0x4d   :  { %1084 = vmatpush1.bf16.msra.mxu1 %v2550_v20  ;;  %1373 = vmatpush1.bf16.msra.mxu0 %v2551_v22  ;;  %v2641_v20 = vld [vmem:[#allocation2 + $0x188] ss:$16 sps:$4 sm:$0xff]   ;;  %v2644_v22 = vld [vmem:[#allocation2 + $0x1ac] ss:$16 sps:$4 sm:$0xff]  }
  0x4e   :  { %1085 = vmatprep.subr.bf16.mxu1 %v2834_v0  ;;  %1374 = vmatprep.subr.bf16.mxu0 %v2834_v0 }
  0x51   :  { %1086 = vmatpush1.bf16.msra.mxu1 %v2552_v23  ;;  %1375 = vmatpush1.bf16.msra.mxu0 %v2553_v24  ;;  %v2646_v23 = vld [vmem:[#allocation2 + $0x1a0] ss:$16 sps:$4 sm:$0xff]   ;;  %v2647_v24 = vld [vmem:[#allocation2 + $0x1a8] ss:$16 sps:$4 sm:$0xff]  }
  0x52   :  { %1087 = vmatprep.subr.bf16.mxu1 %v2834_v0  ;;  %1376 = vmatprep.subr.bf16.mxu0 %v2834_v0 }
  0x55   :  { %1088 = vmatpush1.bf16.msra.mxu1 %v2554_v25  ;;  %1377 = vmatpush1.bf16.msra.mxu0 %v2555_v26  ;;  %v2648_v25 = vld [vmem:[#allocation2 + $0x1c4] ss:$16 sps:$4 sm:$0xff]   ;;  %v2650_v26 = vld [vmem:[#allocation2 + $0x1cc] ss:$16 sps:$4 sm:$0xff]  }
  0x56   :  { %1089 = vmatprep.subr.bf16.mxu1 %v2834_v0  ;;  %1378 = vmatprep.subr.bf16.mxu0 %v2834_v0 }
  0x59   :  { %1090 = vmatpush1.bf16.msra.mxu1 %v2556_v27  ;;  %1379 = vmatpush1.bf16.msra.mxu0 %v2557_v28  ;;  %v2652_v27 = vld [vmem:[#allocation2 + $0x1c0] ss:$16 sps:$4 sm:$0xff]   ;;  %v2653_v28 = vld [vmem:[#allocation2 + $0x1c8] ss:$16 sps:$4 sm:$0xff]  }
  0x5a   :  { %1091 = vmatprep.subr.bf16.mxu1 %v2834_v0  ;;  %1380 = vmatprep.subr.bf16.mxu0 %v2834_v0 }
  0x5d   :  { %1092 = vmatpush1.bf16.msra.mxu1 %v2558_v29  ;;  %1381 = vmatpush1.bf16.msra.mxu0 %v2559_v30  ;;  %v2654_v29 = vld [vmem:[#allocation2 + $0x1e4] ss:$16 sps:$4 sm:$0xff]   ;;  %v2656_v30 = vld [vmem:[#allocation2 + $0x1ec] ss:$16 sps:$4 sm:$0xff]  }
  0x5e   :  { %1093 = vmatprep.subr.bf16.mxu1 %v2834_v0  ;;  %1382 = vmatprep.subr.bf16.mxu0 %v2834_v0 }
  0x61   :  { %1094 = vmatpush1.bf16.msra.mxu1 %v2560_v31  ;;  %1383 = vmatpush1.bf16.msra.mxu0 %v2561_v32  ;;  %v2658_v31 = vld [vmem:[#allocation2 + $0x1e0] ss:$16 sps:$4 sm:$0xff]   ;;  %v2659_v32 = vld [vmem:[#allocation2 + $0x1e8] ss:$16 sps:$4 sm:$0xff]  }
  0x62   :  { %1095 = vmatprep.subr.bf16.mxu1 %v2834_v0  ;;  %1384 = vmatprep.subr.bf16.mxu0 %v2834_v0  ;;  %v2611_v0 = vld [vmem:[#allocation2 + $0xe8] ss:$16 sps:$4 sm:$0xff]  }
  0x65   :  { %1096 = vmatpush1.bf16.msra.mxu1 %v2562_v33  ;;  %1385 = vmatpush1.bf16.msra.mxu0 %v2563_v34  ;;  %v2660_v33 = vld [vmem:[#allocation2 + $0x204] ss:$16 sps:$4 sm:$0xff]   ;;  %v2662_v34 = vld [vmem:[#allocation2 + $0x20c] ss:$16 sps:$4 sm:$0xff]  }
  0x68   :  { %1098 = vmatmul.mubr.bf16.vlgmr.msra.gmra.mrb[0].mxu1 %v2564_v35  ;;  %1387 = vmatmul.mubr.bf16.vlgmr.msra.gmra.mrb[0].mxu0 %v2567_v36  ;;  %v2664_v35 = vld [vmem:[#allocation2 + $0x200] ss:$16 sps:$4 sm:$0xff]   ;;  %v2665_v36 = vld [vmem:[#allocation2 + $0x208] ss:$16 sps:$4 sm:$0xff]  }
  0x69   :  { %1105 = vmatprep.mubr.bf16.mxu1 %v2570_v37  ;;  %1394 = vmatprep.mubr.bf16.mxu0 %v2572_v38  ;;  %v2666_v37 = vld [vmem:[#allocation2 + $0x224] ss:$16 sps:$4 sm:$0xff]   ;;  %v2668_v38 = vld [vmem:[#allocation2 + $0x22c] ss:$16 sps:$4 sm:$0xff]  }
  0x70   :  { %1106 = vmatmul.mubr.bf16.gmra.mrb[4].mxu1 %v2574_v39  ;;  %1395 = vmatmul.mubr.bf16.gmra.mrb[4].mxu0 %v2575_v40  ;;  %v2670_v39 = vld [vmem:[#allocation2 + $0x220] ss:$16 sps:$4 sm:$0xff]   ;;  %v2671_v40 = vld [vmem:[#allocation2 + $0x228] ss:$16 sps:$4 sm:$0xff]  }
  0x71   :  { %1113 = vmatprep.mubr.bf16.mxu1 %v2576_v41  ;;  %1402 = vmatprep.mubr.bf16.mxu0 %v2578_v42  ;;  %v2672_v41 = vld [vmem:[#allocation2 + $0x244] ss:$16 sps:$4 sm:$0xff]   ;;  %v2674_v42 = vld [vmem:[#allocation2 + $0x24c] ss:$16 sps:$4 sm:$0xff]  }
  0x78   :  { %1114 = vmatmul.mubr.bf16.gmra.mrb[8].mxu1 %v2580_v43  ;;  %1403 = vmatmul.mubr.bf16.gmra.mrb[8].mxu0 %v2581_v44  ;;  %v2676_v43 = vld [vmem:[#allocation2 + $0x240] ss:$16 sps:$4 sm:$0xff]   ;;  %v2677_v44 = vld [vmem:[#allocation2 + $0x248] ss:$16 sps:$4 sm:$0xff]  }
  0x79   :  { %1121 = vmatprep.mubr.bf16.mxu1 %v2582_v45  ;;  %1410 = vmatprep.mubr.bf16.mxu0 %v2584_v46  ;;  %v2678_v45 = vld [vmem:[#allocation2 + $0x264] ss:$16 sps:$4 sm:$0xff]   ;;  %v2680_v46 = vld [vmem:[#allocation2 + $0x26c] ss:$16 sps:$4 sm:$0xff]  }
  0x80   :  { %1122 = vmatmul.mubr.bf16.gmra.mrb[12].mxu1 %v2586_v47  ;;  %1411 = vmatmul.mubr.bf16.gmra.mrb[12].mxu0 %v2587_v48  ;;  %v2682_v47 = vld [vmem:[#allocation2 + $0x260] ss:$16 sps:$4 sm:$0xff]   ;;  %v2683_v48 = vld [vmem:[#allocation2 + $0x268] ss:$16 sps:$4 sm:$0xff]  }
  0x81   :  { %1129 = vmatprep.mubr.bf16.mxu1 %v2588_v49  ;;  %1418 = vmatprep.mubr.bf16.mxu0 %v2590_v50  ;;  %v2684_v49 = vld [vmem:[#allocation2 + $0x284] ss:$16 sps:$4 sm:$0xff]   ;;  %v2686_v50 = vld [vmem:[#allocation2 + $0x28c] ss:$16 sps:$4 sm:$0xff]  }
  0x88   :  { %1130 = vmatmul.mubr.bf16.gmra.mrb[16].mxu1 %v2592_v51  ;;  %1419 = vmatmul.mubr.bf16.gmra.mrb[16].mxu0 %v2593_v52  ;;  %v2688_v51 = vld [vmem:[#allocation2 + $0x280] ss:$16 sps:$4 sm:$0xff]   ;;  %v2689_v52 = vld [vmem:[#allocation2 + $0x288] ss:$16 sps:$4 sm:$0xff]  }
  0x89   :  { %1137 = vmatprep.mubr.bf16.mxu1 %v2594_v53  ;;  %1426 = vmatprep.mubr.bf16.mxu0 %v2596_v54  ;;  %v2690_v53 = vld [vmem:[#allocation2 + $0x2a4] ss:$16 sps:$4 sm:$0xff]   ;;  %v2692_v54 = vld [vmem:[#allocation2 + $0x2ac] ss:$16 sps:$4 sm:$0xff]  }
  0x90   :  { %1138 = vmatmul.mubr.bf16.gmra.mrb[20].mxu1 %v2598_v55  ;;  %1427 = vmatmul.mubr.bf16.gmra.mrb[20].mxu0 %v2599_v56  ;;  %v2694_v55 = vld [vmem:[#allocation2 + $0x2a0] ss:$16 sps:$4 sm:$0xff]   ;;  %v2695_v56 = vld [vmem:[#allocation2 + $0x2a8] ss:$16 sps:$4 sm:$0xff]  }
  0x91   :  { %1145 = vmatprep.mubr.bf16.mxu1 %v2600_v57  ;;  %1434 = vmatprep.mubr.bf16.mxu0 %v2602_v58  ;;  %v2696_v57 = vld [vmem:[#allocation2 + $0x2c4] ss:$16 sps:$4 sm:$0xff]   ;;  %v2698_v58 = vld [vmem:[#allocation2 + $0x2cc] ss:$16 sps:$4 sm:$0xff]  }
  0x98   :  { %1146 = vmatmul.mubr.bf16.gmra.mrb[24].mxu1 %v2604_v59  ;;  %1435 = vmatmul.mubr.bf16.gmra.mrb[24].mxu0 %v2605_v60  ;;  %v2700_v59 = vld [vmem:[#allocation2 + $0x2c0] ss:$16 sps:$4 sm:$0xff]   ;;  %v2701_v60 = vld [vmem:[#allocation2 + $0x2c8] ss:$16 sps:$4 sm:$0xff]  }
  0x99   :  { %1153 = vmatprep.mubr.bf16.mxu1 %v2606_v61  ;;  %1442 = vmatprep.mubr.bf16.mxu0 %v2608_v62  ;;  %v2702_v61 = vld [vmem:[#allocation2 + $0x2e4] ss:$16 sps:$4 sm:$0xff]   ;;  %v2704_v62 = vld [vmem:[#allocation2 + $0x2ec] ss:$16 sps:$4 sm:$0xff]  }
  0xa0   :  { %1154 = vmatmul.mubr.bf16.gmra.mrb[28].mxu1 %v2610_v63  ;;  %1443 = vmatmul.mubr.bf16.gmra.mrb[28].mxu0 %v2611_v0  ;;  %v2706_v63 = vld [vmem:[#allocation2 + $0x2e0] ss:$16 sps:$4 sm:$0xff]   ;;  %v2707_v0 = vld [vmem:[#allocation2 + $0x2e8] ss:$16 sps:$4 sm:$0xff]  }
  0xa1   :  { %1161 = vmatprep.mubr.bf16.mxu1 %v2612_v1  ;;  %1450 = vmatprep.mubr.bf16.mxu0 %v2614_v2  ;;  %v2708_v1 = vld [vmem:[#allocation2 + $0x304] ss:$16 sps:$4 sm:$0xff]   ;;  %v2710_v2 = vld [vmem:[#allocation2 + $0x30c] ss:$16 sps:$4 sm:$0xff]  }
  0xa8   :  { %1162 = vmatmul.mubr.bf16.gmra.mrb[32].mxu1 %v2616_v3  ;;  %1451 = vmatmul.mubr.bf16.gmra.mrb[32].mxu0 %v2617_v4  ;;  %v2712_v3 = vld [vmem:[#allocation2 + $0x300] ss:$16 sps:$4 sm:$0xff]   ;;  %v2713_v4 = vld [vmem:[#allocation2 + $0x308] ss:$16 sps:$4 sm:$0xff]  }
  0xa9   :  { %1169 = vmatprep.mubr.bf16.mxu1 %v2618_v5  ;;  %1458 = vmatprep.mubr.bf16.mxu0 %v2620_v6  ;;  %v2714_v5 = vld [vmem:[#allocation2 + $0x324] ss:$16 sps:$4 sm:$0xff]   ;;  %v2716_v6 = vld [vmem:[#allocation2 + $0x32c] ss:$16 sps:$4 sm:$0xff]  }
  0xb0   :  { %1170 = vmatmul.mubr.bf16.gmra.mrb[36].mxu1 %v2622_v7  ;;  %1459 = vmatmul.mubr.bf16.gmra.mrb[36].mxu0 %v2623_v8  ;;  %v2718_v7 = vld [vmem:[#allocation2 + $0x320] ss:$16 sps:$4 sm:$0xff]   ;;  %v2719_v8 = vld [vmem:[#allocation2 + $0x328] ss:$16 sps:$4 sm:$0xff]  }
  0xb1   :  { %1177 = vmatprep.mubr.bf16.mxu1 %v2624_v9  ;;  %1466 = vmatprep.mubr.bf16.mxu0 %v2626_v10  ;;  %v2720_v9 = vld [vmem:[#allocation2 + $0x344] ss:$16 sps:$4 sm:$0xff]   ;;  %v2722_v10 = vld [vmem:[#allocation2 + $0x34c] ss:$16 sps:$4 sm:$0xff]  }
  0xb8   :  { %1178 = vmatmul.mubr.bf16.gmra.mrb[40].mxu1 %v2628_v11  ;;  %1467 = vmatmul.mubr.bf16.gmra.mrb[40].mxu0 %v2629_v12  ;;  %v2724_v11 = vld [vmem:[#allocation2 + $0x340] ss:$16 sps:$4 sm:$0xff]   ;;  %v2725_v12 = vld [vmem:[#allocation2 + $0x348] ss:$16 sps:$4 sm:$0xff]  }
  0xb9   :  { %1185 = vmatprep.mubr.bf16.mxu1 %v2630_v13  ;;  %1474 = vmatprep.mubr.bf16.mxu0 %v2632_v14  ;;  %v2726_v13 = vld [vmem:[#allocation2 + $0x364] ss:$16 sps:$4 sm:$0xff]   ;;  %v2728_v14 = vld [vmem:[#allocation2 + $0x36c] ss:$16 sps:$4 sm:$0xff]  }
  0xc0   :  { %1186 = vmatmul.mubr.bf16.gmra.mrb[44].mxu1 %v2634_v15  ;;  %1475 = vmatmul.mubr.bf16.gmra.mrb[44].mxu0 %v2635_v16 }
  0xc1   :  { %1193 = vmatprep.mubr.bf16.mxu1 %v2636_v17  ;;  %1482 = vmatprep.mubr.bf16.mxu0 %v2638_v18  ;;  %v2730_v18 = vld [vmem:[#allocation2 + $0x360] ss:$16 sps:$4 sm:$0xff]  }
  0xc8   :  { %1194 = vmatmul.mubr.bf16.gmra.mrb[48].mxu1 %v2640_v19  ;;  %1483 = vmatmul.mubr.bf16.gmra.mrb[48].mxu0 %v2641_v20 }
  0xc9   :  { %1201 = vmatprep.mubr.bf16.mxu1 %v2642_v21  ;;  %1490 = vmatprep.mubr.bf16.mxu0 %v2644_v22  ;;  %v2731_v22 = vld [vmem:[#allocation2 + $0x368] ss:$16 sps:$4 sm:$0xff]  }
  0xd0   :  { %1202 = vmatmul.mubr.bf16.gmra.mrb[52].mxu1 %v2646_v23  ;;  %1491 = vmatmul.mubr.bf16.gmra.mrb[52].mxu0 %v2647_v24  ;;  %v2732_v23 = vld [vmem:[#allocation2 + $0x384] ss:$16 sps:$4 sm:$0xff]  }
  0xd1   :  { %1209 = vmatprep.mubr.bf16.mxu1 %v2648_v25  ;;  %1498 = vmatprep.mubr.bf16.mxu0 %v2650_v26  ;;  %v2734_v26 = vld [vmem:[#allocation2 + $0x38c] ss:$16 sps:$4 sm:$0xff]  }
  0xd8   :  { %1210 = vmatmul.mubr.bf16.gmra.mrb[56].mxu1 %v2652_v27  ;;  %1499 = vmatmul.mubr.bf16.gmra.mrb[56].mxu0 %v2653_v28 }
  0xd9   :  { %1217 = vmatprep.mubr.bf16.mxu1 %v2654_v29  ;;  %1506 = vmatprep.mubr.bf16.mxu0 %v2656_v30 }
  0xe0   :  { %1218 = vmatmul.mubr.bf16.gmra.mrb[60].mxu1 %v2658_v31  ;;  %1507 = vmatmul.mubr.bf16.gmra.mrb[60].mxu0 %v2659_v32 }
  0xe1   :  { %1225 = vmatprep.mubr.bf16.mxu1 %v2660_v33  ;;  %1514 = vmatprep.mubr.bf16.mxu0 %v2662_v34  ;;  %v2736_v33 = vld [vmem:[#allocation2 + $0x380] ss:$16 sps:$4 sm:$0xff]  }
  0xe8   :  { %1226 = vmatmul.mubr.bf16.gmra.mrb[64].mxu1 %v2664_v35  ;;  %1515 = vmatmul.mubr.bf16.gmra.mrb[64].mxu0 %v2665_v36 }
  0xe9   :  { %1233 = vmatprep.mubr.bf16.mxu1 %v2666_v37  ;;  %1522 = vmatprep.mubr.bf16.mxu0 %v2668_v38  ;;  %v2737_v37 = vld [vmem:[#allocation2 + $0x388] ss:$16 sps:$4 sm:$0xff]   ;;  %v2738_v38 = vld [vmem:[#allocation2 + $0x3a4] ss:$16 sps:$4 sm:$0xff]  }
  0xf0   :  { %1234 = vmatmul.mubr.bf16.gmra.mrb[68].mxu1 %v2670_v39  ;;  %1523 = vmatmul.mubr.bf16.gmra.mrb[68].mxu0 %v2671_v40 }
  0xf1   :  { %1241 = vmatprep.mubr.bf16.mxu1 %v2672_v41  ;;  %1530 = vmatprep.mubr.bf16.mxu0 %v2674_v42  ;;  %v2740_v41 = vld [vmem:[#allocation2 + $0x3ac] ss:$16 sps:$4 sm:$0xff]  }
  0xf8   :  { %1242 = vmatmul.mubr.bf16.gmra.mrb[72].mxu1 %v2676_v43  ;;  %1531 = vmatmul.mubr.bf16.gmra.mrb[72].mxu0 %v2677_v44 }
  0xf9   :  { %1249 = vmatprep.mubr.bf16.mxu1 %v2678_v45  ;;  %1538 = vmatprep.mubr.bf16.mxu0 %v2680_v46 }
 0x100   :  { %1250 = vmatmul.mubr.bf16.gmra.mrb[76].mxu1 %v2682_v47  ;;  %1539 = vmatmul.mubr.bf16.gmra.mrb[76].mxu0 %v2683_v48  ;;  %v2742_v48 = vld [vmem:[#allocation2 + $0x3a0] ss:$16 sps:$4 sm:$0xff]  }
 0x101   :  { %1257 = vmatprep.mubr.bf16.mxu1 %v2684_v49  ;;  %1546 = vmatprep.mubr.bf16.mxu0 %v2686_v50 }
 0x108   :  { %1258 = vmatmul.mubr.bf16.gmra.mrb[80].mxu1 %v2688_v51  ;;  %1547 = vmatmul.mubr.bf16.gmra.mrb[80].mxu0 %v2689_v52  ;;  %v2743_v52 = vld [vmem:[#allocation2 + $0x3a8] ss:$16 sps:$4 sm:$0xff]  }
 0x109   :  { %1265 = vmatprep.mubr.bf16.mxu1 %v2690_v53  ;;  %1554 = vmatprep.mubr.bf16.mxu0 %v2692_v54  ;;  %v2744_v53 = vld [vmem:[#allocation2 + $0x3c4] ss:$16 sps:$4 sm:$0xff]  }
 0x110   :  { %1266 = vmatmul.mubr.bf16.gmra.mrb[84].mxu1 %v2694_v55  ;;  %1555 = vmatmul.mubr.bf16.gmra.mrb[84].mxu0 %v2695_v56  ;;  %v2746_v56 = vld [vmem:[#allocation2 + $0x3cc] ss:$16 sps:$4 sm:$0xff]  }
 0x111   :  { %1273 = vmatprep.mubr.bf16.mxu1 %v2696_v57  ;;  %1562 = vmatprep.mubr.bf16.mxu0 %v2698_v58 }
 0x118   :  { %1274 = vmatmul.mubr.bf16.gmra.mrb[88].mxu1 %v2700_v59  ;;  %1563 = vmatmul.mubr.bf16.gmra.mrb[88].mxu0 %v2701_v60 }
 0x119   :  { %1281 = vmatprep.mubr.bf16.mxu1 %v2702_v61  ;;  %1570 = vmatprep.mubr.bf16.mxu0 %v2704_v62 }
 0x120   :  { %1282 = vmatmul.mubr.bf16.gmra.mrb[92].mxu1 %v2706_v63  ;;  %1571 = vmatmul.mubr.bf16.gmra.mrb[92].mxu0 %v2707_v0  ;;  %v2748_v63 = vld [vmem:[#allocation2 + $0x3c0] ss:$16 sps:$4 sm:$0xff]  }
 0x121   :  { %1289 = vmatprep.mubr.bf16.mxu1 %v2708_v1  ;;  %1578 = vmatprep.mubr.bf16.mxu0 %v2710_v2 }
 0x128   :  { %1290 = vmatmul.mubr.bf16.gmra.mrb[96].mxu1 %v2712_v3  ;;  %1579 = vmatmul.mubr.bf16.gmra.mrb[96].mxu0 %v2713_v4  ;;  %v2749_v3 = vld [vmem:[#allocation2 + $0x3c8] ss:$16 sps:$4 sm:$0xff]   ;;  %v2750_v4 = vld [vmem:[#allocation2 + $0x3e4] ss:$16 sps:$4 sm:$0xff]  }
 0x129   :  { %1297 = vmatprep.mubr.bf16.mxu1 %v2714_v5  ;;  %1586 = vmatprep.mubr.bf16.mxu0 %v2716_v6 }
 0x130   :  { %1298 = vmatmul.mubr.bf16.gmra.mrb[100].mxu1 %v2718_v7  ;;  %1587 = vmatmul.mubr.bf16.gmra.mrb[100].mxu0 %v2719_v8  ;;  %v2752_v7 = vld [vmem:[#allocation2 + $0x3ec] ss:$16 sps:$4 sm:$0xff]  }
 0x131   :  { %1305 = vmatprep.mubr.bf16.mxu1 %v2720_v9  ;;  %1594 = vmatprep.mubr.bf16.mxu0 %v2722_v10 }
 0x138   :  { %1306 = vmatmul.mubr.bf16.gmra.mrb[104].mxu1 %v2724_v11  ;;  %1595 = vmatmul.mubr.bf16.gmra.mrb[104].mxu0 %v2725_v12 }
 0x139   :  { %1313 = vmatprep.mubr.bf16.mxu1 %v2726_v13  ;;  %1602 = vmatprep.mubr.bf16.mxu0 %v2728_v14  ;;  %v2754_v14 = vld [vmem:[#allocation2 + $0x3e0] ss:$16 sps:$4 sm:$0xff]  }
 0x13b   :  { %v1099_v15 = vpop.f32.mrb[0].mxu1  ;;  %v1388_v16 = vpop.f32.mrb[0].mxu0 }
 0x13c   :  { %v1101_v17 = vpop.f32.mrb[1].mxu1  ;;  %v1389_v19 = vadd.f32 %v1388_v16, %v1099_v15  ;;  %v1390_v20 = vpop.f32.mrb[1].mxu0 }
 0x13d   :  { %v1102_v21 = vpop.f32.mrb[2].mxu1  ;;  %v1391_v24 = vpop.f32.mrb[2].mxu0 }
 0x13e   :  { %v1104_v25 = vpop.f32.mrb[3].mxu1  ;;  %v1392_v27 = vadd.f32 %v1391_v24, %v1102_v21  ;;  %v1393_v28 = vpop.f32.mrb[3].mxu0 }
 0x140   :  { %1314 = vmatmul.mubr.bf16.gmra.mrb[108].mxu1 %v2730_v18  ;;  %v2272_v29 = vpack.c.bf16 %v1392_v27, %v1389_v19  ;;  %1603 = vmatmul.mubr.bf16.gmra.mrb[108].mxu0 %v2731_v22  ;;  %v2755_v18 = vld [vmem:[#allocation2 + $0x3e8] ss:$16 sps:$4 sm:$0xff]  }
 0x141   :  { %1321 = vmatprep.mubr.bf16.mxu1 %v2732_v23  ;;  %1610 = vmatprep.mubr.bf16.mxu0 %v2734_v26 }
 0x142   :  { %2273 = vst [vmem:[#allocation7] sm:$0xff] %v2272_v29  }
 0x143   :  { %v1107_v30 = vpop.f32.mrb[4].mxu1  ;;  %v1396_v31 = vpop.f32.mrb[4].mxu0 }
 0x144   :  { %v1109_v32 = vpop.f32.mrb[5].mxu1  ;;  %v1397_v34 = vadd.f32 %v1396_v31, %v1107_v30  ;;  %v1398_v35 = vpop.f32.mrb[5].mxu0 }
 0x145   :  { %v1110_v36 = vpop.f32.mrb[6].mxu1  ;;  %v1399_v39 = vpop.f32.mrb[6].mxu0 }
 0x146   :  { %v1112_v40 = vpop.f32.mrb[7].mxu1  ;;  %v1400_v42 = vadd.f32 %v1399_v39, %v1110_v36  ;;  %v1401_v43 = vpop.f32.mrb[7].mxu0 }
 0x148   :  { %1322 = vmatmul.mubr.bf16.gmra.mrb[112].mxu1 %v2736_v33  ;;  %v2277_v44 = vpack.c.bf16 %v1400_v42, %v1397_v34  ;;  %1611 = vmatmul.mubr.bf16.gmra.mrb[112].mxu0 %v2737_v37 }
 0x149   :  { %1329 = vmatprep.mubr.bf16.mxu1 %v2738_v38  ;;  %1618 = vmatprep.mubr.bf16.mxu0 %v2740_v41 }
 0x14a   :  { %2429 = vst [vmem:[#allocation7 + $0x8] sm:$0xff] %v2277_v44  }
 0x14b   :  { %v1115_v45 = vpop.f32.mrb[8].mxu1  ;;  %v1404_v46 = vpop.f32.mrb[8].mxu0 }
 0x14c   :  { %v1117_v47 = vpop.f32.mrb[9].mxu1  ;;  %v1405_v49 = vadd.f32 %v1404_v46, %v1115_v45  ;;  %v1406_v50 = vpop.f32.mrb[9].mxu0 }
 0x14d   :  { %v1118_v51 = vpop.f32.mrb[10].mxu1  ;;  %v1407_v54 = vpop.f32.mrb[10].mxu0 }
 0x14e   :  { %v1120_v55 = vpop.f32.mrb[11].mxu1  ;;  %v1408_v57 = vadd.f32 %v1407_v54, %v1118_v51  ;;  %v1409_v58 = vpop.f32.mrb[11].mxu0 }
 0x150   :  { %1330 = vmatmul.mubr.bf16.gmra.mrb[116].mxu1 %v2742_v48  ;;  %v2282_v59 = vpack.c.bf16 %v1408_v57, %v1405_v49  ;;  %1619 = vmatmul.mubr.bf16.gmra.mrb[116].mxu0 %v2743_v52 }
 0x151   :  { %1337 = vmatprep.mubr.bf16.mxu1 %v2744_v53  ;;  %1626 = vmatprep.mubr.bf16.mxu0 %v2746_v56 }
 0x152   :  { %2430 = vst [vmem:[#allocation7 + $0x10] sm:$0xff] %v2282_v59  }
 0x153   :  { %v1123_v60 = vpop.f32.mrb[12].mxu1  ;;  %v1412_v61 = vpop.f32.mrb[12].mxu0 }
 0x154   :  { %v1125_v62 = vpop.f32.mrb[13].mxu1  ;;  %v1413_v0 = vadd.f32 %v1412_v61, %v1123_v60  ;;  %v1414_v1 = vpop.f32.mrb[13].mxu0 }
 0x155   :  { %v1126_v2 = vpop.f32.mrb[14].mxu1  ;;  %v1415_v5 = vpop.f32.mrb[14].mxu0 }
 0x156   :  { %v1128_v6 = vpop.f32.mrb[15].mxu1  ;;  %v1416_v8 = vadd.f32 %v1415_v5, %v1126_v2  ;;  %v1417_v9 = vpop.f32.mrb[15].mxu0 }
 0x158   :  { %1338 = vmatmul.mubr.bf16.gmra.mrb[120].mxu1 %v2748_v63  ;;  %v2287_v10 = vpack.c.bf16 %v1416_v8, %v1413_v0  ;;  %1627 = vmatmul.mubr.bf16.gmra.mrb[120].mxu0 %v2749_v3 }
 0x159   :  { %1345 = vmatprep.mubr.bf16.mxu1 %v2750_v4  ;;  %1634 = vmatprep.mubr.bf16.mxu0 %v2752_v7 }
 0x15a   :  { %2431 = vst [vmem:[#allocation7 + $0x18] sm:$0xff] %v2287_v10  }
 0x15b   :  { %v1131_v11 = vpop.f32.mrb[16].mxu1  ;;  %v1420_v12 = vpop.f32.mrb[16].mxu0 }
 0x15c   :  { %v1133_v13 = vpop.f32.mrb[17].mxu1  ;;  %v1421_v15 = vadd.f32 %v1420_v12, %v1131_v11  ;;  %v1422_v16 = vpop.f32.mrb[17].mxu0 }
 0x15d   :  { %v1134_v17 = vpop.f32.mrb[18].mxu1  ;;  %v1423_v19 = vpop.f32.mrb[18].mxu0 }
 0x15e   :  { %v1136_v20 = vpop.f32.mrb[19].mxu1  ;;  %v1424_v21 = vadd.f32 %v1423_v19, %v1134_v17  ;;  %v1425_v22 = vpop.f32.mrb[19].mxu0 }
 0x160   :  { %1346 = vmatmul.mubr.bf16.gmra.mrb[124].mxu1 %v2754_v14  ;;  %v2292_v23 = vpack.c.bf16 %v1424_v21, %v1421_v15  ;;  %1635 = vmatmul.mubr.bf16.gmra.mrb[124].mxu0 %v2755_v18 }
 0x162   :  { %2432 = vst [vmem:[#allocation7 + $0x20] sm:$0xff] %v2292_v23  }
 0x163   :  { %v1139_v24 = vpop.f32.mrb[20].mxu1  ;;  %v1428_v25 = vpop.f32.mrb[20].mxu0 }
 0x164   :  { %v1141_v26 = vpop.f32.mrb[21].mxu1  ;;  %v1429_v27 = vadd.f32 %v1428_v25, %v1139_v24  ;;  %v1430_v28 = vpop.f32.mrb[21].mxu0 }
 0x165   :  { %v1142_v29 = vpop.f32.mrb[22].mxu1  ;;  %v1431_v30 = vpop.f32.mrb[22].mxu0 }
 0x166   :  { %v1144_v31 = vpop.f32.mrb[23].mxu1  ;;  %v1432_v32 = vadd.f32 %v1431_v30, %v1142_v29  ;;  %v1433_v33 = vpop.f32.mrb[23].mxu0 }
 0x168   :  { %v2297_v34 = vpack.c.bf16 %v1432_v32, %v1429_v27 }
 0x16a   :  { %2433 = vst [vmem:[#allocation7 + $0x28] sm:$0xff] %v2297_v34  }
 0x16b   :  { %v1147_v35 = vpop.f32.mrb[24].mxu1  ;;  %v1436_v36 = vpop.f32.mrb[24].mxu0 }
 0x16c   :  { %v1149_v37 = vpop.f32.mrb[25].mxu1  ;;  %v1437_v38 = vadd.f32 %v1436_v36, %v1147_v35  ;;  %v1438_v39 = vpop.f32.mrb[25].mxu0 }
 0x16d   :  { %v1150_v40 = vpop.f32.mrb[26].mxu1  ;;  %v1439_v41 = vpop.f32.mrb[26].mxu0 }
 0x16e   :  { %v1152_v42 = vpop.f32.mrb[27].mxu1  ;;  %v1440_v43 = vadd.f32 %v1439_v41, %v1150_v40  ;;  %v1441_v44 = vpop.f32.mrb[27].mxu0 }
 0x170   :  { %v2302_v45 = vpack.c.bf16 %v1440_v43, %v1437_v38 }
 0x172   :  { %2434 = vst [vmem:[#allocation7 + $0x30] sm:$0xff] %v2302_v45  }
 0x173   :  { %v1155_v46 = vpop.f32.mrb[28].mxu1  ;;  %v1444_v47 = vpop.f32.mrb[28].mxu0 }
 0x174   :  { %v1157_v48 = vpop.f32.mrb[29].mxu1  ;;  %v1445_v49 = vadd.f32 %v1444_v47, %v1155_v46  ;;  %v1446_v50 = vpop.f32.mrb[29].mxu0 }
 0x175   :  { %v1158_v51 = vpop.f32.mrb[30].mxu1  ;;  %v1447_v52 = vpop.f32.mrb[30].mxu0 }
 0x176   :  { %v1160_v53 = vpop.f32.mrb[31].mxu1  ;;  %v1448_v54 = vadd.f32 %v1447_v52, %v1158_v51  ;;  %v1449_v55 = vpop.f32.mrb[31].mxu0 }
 0x178   :  { %v2307_v56 = vpack.c.bf16 %v1448_v54, %v1445_v49 }
 0x17a   :  { %2435 = vst [vmem:[#allocation7 + $0x38] sm:$0xff] %v2307_v56  }
 0x17b   :  { %v1163_v57 = vpop.f32.mrb[32].mxu1  ;;  %v1452_v58 = vpop.f32.mrb[32].mxu0 }
 0x17c   :  { %v1165_v59 = vpop.f32.mrb[33].mxu1  ;;  %v1453_v60 = vadd.f32 %v1452_v58, %v1163_v57  ;;  %v1454_v61 = vpop.f32.mrb[33].mxu0 }
 0x17d   :  { %v1166_v62 = vpop.f32.mrb[34].mxu1  ;;  %v1455_v63 = vpop.f32.mrb[34].mxu0 }
 0x17e   :  { %v1168_v0 = vpop.f32.mrb[35].mxu1  ;;  %v1456_v1 = vadd.f32 %v1455_v63, %v1166_v62  ;;  %v1457_v2 = vpop.f32.mrb[35].mxu0 }
 0x180   :  { %v2312_v3 = vpack.c.bf16 %v1456_v1, %v1453_v60 }
 0x182   :  { %2436 = vst [vmem:[#allocation7 + $0x40] sm:$0xff] %v2312_v3  }
 0x183   :  { %v1171_v4 = vpop.f32.mrb[36].mxu1  ;;  %v1460_v5 = vpop.f32.mrb[36].mxu0 }
 0x184   :  { %v1173_v6 = vpop.f32.mrb[37].mxu1  ;;  %v1461_v7 = vadd.f32 %v1460_v5, %v1171_v4  ;;  %v1462_v8 = vpop.f32.mrb[37].mxu0 }
 0x185   :  { %v1174_v9 = vpop.f32.mrb[38].mxu1  ;;  %v1463_v10 = vpop.f32.mrb[38].mxu0 }
 0x186   :  { %v1176_v11 = vpop.f32.mrb[39].mxu1  ;;  %v1464_v12 = vadd.f32 %v1463_v10, %v1174_v9  ;;  %v1465_v13 = vpop.f32.mrb[39].mxu0 }
 0x188   :  { %v2317_v14 = vpack.c.bf16 %v1464_v12, %v1461_v7 }
 0x18a   :  { %2437 = vst [vmem:[#allocation7 + $0x48] sm:$0xff] %v2317_v14  }
 0x18b   :  { %v1179_v15 = vpop.f32.mrb[40].mxu1  ;;  %v1468_v16 = vpop.f32.mrb[40].mxu0 }
 0x18c   :  { %v1181_v17 = vpop.f32.mrb[41].mxu1  ;;  %v1469_v18 = vadd.f32 %v1468_v16, %v1179_v15  ;;  %v1470_v19 = vpop.f32.mrb[41].mxu0 }
 0x18d   :  { %v1182_v20 = vpop.f32.mrb[42].mxu1  ;;  %v1471_v21 = vpop.f32.mrb[42].mxu0 }
 0x18e   :  { %v1184_v22 = vpop.f32.mrb[43].mxu1  ;;  %v1472_v23 = vadd.f32 %v1471_v21, %v1182_v20  ;;  %v1473_v24 = vpop.f32.mrb[43].mxu0 }
 0x190   :  { %v2322_v25 = vpack.c.bf16 %v1472_v23, %v1469_v18 }
 0x192   :  { %2438 = vst [vmem:[#allocation7 + $0x50] sm:$0xff] %v2322_v25  }
 0x193   :  { %v1187_v26 = vpop.f32.mrb[44].mxu1  ;;  %v1476_v27 = vpop.f32.mrb[44].mxu0 }
 0x194   :  { %v1189_v28 = vpop.f32.mrb[45].mxu1  ;;  %v1477_v29 = vadd.f32 %v1476_v27, %v1187_v26  ;;  %v1478_v30 = vpop.f32.mrb[45].mxu0 }
 0x195   :  { %v1190_v31 = vpop.f32.mrb[46].mxu1  ;;  %v1479_v32 = vpop.f32.mrb[46].mxu0 }
 0x196   :  { %v1192_v33 = vpop.f32.mrb[47].mxu1  ;;  %v1480_v34 = vadd.f32 %v1479_v32, %v1190_v31  ;;  %v1481_v35 = vpop.f32.mrb[47].mxu0 }
 0x198   :  { %v2327_v36 = vpack.c.bf16 %v1480_v34, %v1477_v29 }
 0x19a   :  { %2439 = vst [vmem:[#allocation7 + $0x58] sm:$0xff] %v2327_v36  }
 0x19b   :  { %v1195_v37 = vpop.f32.mrb[48].mxu1  ;;  %v1484_v38 = vpop.f32.mrb[48].mxu0 }
 0x19c   :  { %v1197_v39 = vpop.f32.mrb[49].mxu1  ;;  %v1485_v40 = vadd.f32 %v1484_v38, %v1195_v37  ;;  %v1486_v41 = vpop.f32.mrb[49].mxu0 }
 0x19d   :  { %v1198_v42 = vpop.f32.mrb[50].mxu1  ;;  %v1487_v43 = vpop.f32.mrb[50].mxu0 }
 0x19e   :  { %v1200_v44 = vpop.f32.mrb[51].mxu1  ;;  %v1488_v45 = vadd.f32 %v1487_v43, %v1198_v42  ;;  %v1489_v46 = vpop.f32.mrb[51].mxu0 }
 0x1a0   :  { %v2332_v47 = vpack.c.bf16 %v1488_v45, %v1485_v40 }
 0x1a2   :  { %2440 = vst [vmem:[#allocation7 + $0x60] sm:$0xff] %v2332_v47  }
 0x1a3   :  { %v1203_v48 = vpop.f32.mrb[52].mxu1  ;;  %v1492_v49 = vpop.f32.mrb[52].mxu0 }
 0x1a4   :  { %v1205_v50 = vpop.f32.mrb[53].mxu1  ;;  %v1493_v51 = vadd.f32 %v1492_v49, %v1203_v48  ;;  %v1494_v52 = vpop.f32.mrb[53].mxu0 }
 0x1a5   :  { %v1206_v53 = vpop.f32.mrb[54].mxu1  ;;  %v1495_v54 = vpop.f32.mrb[54].mxu0 }
 0x1a6   :  { %v1208_v55 = vpop.f32.mrb[55].mxu1  ;;  %v1496_v56 = vadd.f32 %v1495_v54, %v1206_v53  ;;  %v1497_v57 = vpop.f32.mrb[55].mxu0 }
 0x1a8   :  { %v2337_v58 = vpack.c.bf16 %v1496_v56, %v1493_v51 }
 0x1aa   :  { %2441 = vst [vmem:[#allocation7 + $0x68] sm:$0xff] %v2337_v58  }
 0x1ab   :  { %v1211_v59 = vpop.f32.mrb[56].mxu1  ;;  %v1500_v60 = vpop.f32.mrb[56].mxu0 }
 0x1ac   :  { %v1213_v61 = vpop.f32.mrb[57].mxu1  ;;  %v1501_v62 = vadd.f32 %v1500_v60, %v1211_v59  ;;  %v1502_v63 = vpop.f32.mrb[57].mxu0 }
 0x1ad   :  { %v1214_v0 = vpop.f32.mrb[58].mxu1  ;;  %v1503_v1 = vpop.f32.mrb[58].mxu0 }
 0x1ae   :  { %v1216_v2 = vpop.f32.mrb[59].mxu1  ;;  %v1504_v3 = vadd.f32 %v1503_v1, %v1214_v0  ;;  %v1505_v4 = vpop.f32.mrb[59].mxu0 }
 0x1b0   :  { %v2342_v5 = vpack.c.bf16 %v1504_v3, %v1501_v62 }
 0x1b2   :  { %2442 = vst [vmem:[#allocation7 + $0x70] sm:$0xff] %v2342_v5  }
 0x1b3   :  { %v1219_v6 = vpop.f32.mrb[60].mxu1  ;;  %v1508_v7 = vpop.f32.mrb[60].mxu0 }
 0x1b4   :  { %v1221_v8 = vpop.f32.mrb[61].mxu1  ;;  %v1509_v9 = vadd.f32 %v1508_v7, %v1219_v6  ;;  %v1510_v10 = vpop.f32.mrb[61].mxu0 }
 0x1b5   :  { %v1222_v11 = vpop.f32.mrb[62].mxu1  ;;  %v1511_v12 = vpop.f32.mrb[62].mxu0 }
 0x1b6   :  { %v1224_v13 = vpop.f32.mrb[63].mxu1  ;;  %v1512_v14 = vadd.f32 %v1511_v12, %v1222_v11  ;;  %v1513_v15 = vpop.f32.mrb[63].mxu0 }
 0x1b8   :  { %v2347_v16 = vpack.c.bf16 %v1512_v14, %v1509_v9 }
 0x1ba   :  { %2443 = vst [vmem:[#allocation7 + $0x78] sm:$0xff] %v2347_v16  }
 0x1bb   :  { %v1227_v17 = vpop.f32.mrb[64].mxu1  ;;  %v1516_v18 = vpop.f32.mrb[64].mxu0 }
 0x1bc   :  { %v1229_v19 = vpop.f32.mrb[65].mxu1  ;;  %v1517_v20 = vadd.f32 %v1516_v18, %v1227_v17  ;;  %v1518_v21 = vpop.f32.mrb[65].mxu0 }
 0x1bd   :  { %v1230_v22 = vpop.f32.mrb[66].mxu1  ;;  %v1519_v23 = vpop.f32.mrb[66].mxu0 }
 0x1be   :  { %v1232_v24 = vpop.f32.mrb[67].mxu1  ;;  %v1520_v25 = vadd.f32 %v1519_v23, %v1230_v22  ;;  %v1521_v26 = vpop.f32.mrb[67].mxu0 }
 0x1c0   :  { %v2352_v27 = vpack.c.bf16 %v1520_v25, %v1517_v20 }
 0x1c2   :  { %2444 = vst [vmem:[#allocation7 + $0x80] sm:$0xff] %v2352_v27  }
 0x1c3   :  { %v1235_v28 = vpop.f32.mrb[68].mxu1  ;;  %v1524_v29 = vpop.f32.mrb[68].mxu0 }
 0x1c4   :  { %v1237_v30 = vpop.f32.mrb[69].mxu1  ;;  %v1525_v31 = vadd.f32 %v1524_v29, %v1235_v28  ;;  %v1526_v32 = vpop.f32.mrb[69].mxu0 }
 0x1c5   :  { %v1238_v33 = vpop.f32.mrb[70].mxu1  ;;  %v1527_v34 = vpop.f32.mrb[70].mxu0 }
 0x1c6   :  { %v1240_v35 = vpop.f32.mrb[71].mxu1  ;;  %v1528_v36 = vadd.f32 %v1527_v34, %v1238_v33  ;;  %v1529_v37 = vpop.f32.mrb[71].mxu0 }
 0x1c8   :  { %v2357_v38 = vpack.c.bf16 %v1528_v36, %v1525_v31 }
 0x1ca   :  { %2445 = vst [vmem:[#allocation7 + $0x88] sm:$0xff] %v2357_v38  }
 0x1cb   :  { %v1243_v39 = vpop.f32.mrb[72].mxu1  ;;  %v1532_v40 = vpop.f32.mrb[72].mxu0 }
 0x1cc   :  { %v1245_v41 = vpop.f32.mrb[73].mxu1  ;;  %v1533_v42 = vadd.f32 %v1532_v40, %v1243_v39  ;;  %v1534_v43 = vpop.f32.mrb[73].mxu0 }
 0x1cd   :  { %v1246_v44 = vpop.f32.mrb[74].mxu1  ;;  %v1535_v45 = vpop.f32.mrb[74].mxu0 }
 0x1ce   :  { %v1248_v46 = vpop.f32.mrb[75].mxu1  ;;  %v1536_v47 = vadd.f32 %v1535_v45, %v1246_v44  ;;  %v1537_v48 = vpop.f32.mrb[75].mxu0 }
 0x1d0   :  { %v2362_v49 = vpack.c.bf16 %v1536_v47, %v1533_v42 }
 0x1d2   :  { %2446 = vst [vmem:[#allocation7 + $0x90] sm:$0xff] %v2362_v49  }
 0x1d3   :  { %v1251_v50 = vpop.f32.mrb[76].mxu1  ;;  %v1540_v51 = vpop.f32.mrb[76].mxu0 }
 0x1d4   :  { %v1253_v52 = vpop.f32.mrb[77].mxu1  ;;  %v1541_v53 = vadd.f32 %v1540_v51, %v1251_v50  ;;  %v1542_v54 = vpop.f32.mrb[77].mxu0 }
 0x1d5   :  { %v1254_v55 = vpop.f32.mrb[78].mxu1  ;;  %v1543_v56 = vpop.f32.mrb[78].mxu0 }
 0x1d6   :  { %v1256_v57 = vpop.f32.mrb[79].mxu1  ;;  %v1544_v58 = vadd.f32 %v1543_v56, %v1254_v55  ;;  %v1545_v59 = vpop.f32.mrb[79].mxu0 }
 0x1d8   :  { %v2367_v60 = vpack.c.bf16 %v1544_v58, %v1541_v53 }
 0x1da   :  { %2447 = vst [vmem:[#allocation7 + $0x98] sm:$0xff] %v2367_v60  }
 0x1db   :  { %v1259_v61 = vpop.f32.mrb[80].mxu1  ;;  %v1548_v62 = vpop.f32.mrb[80].mxu0 }
 0x1dc   :  { %v1261_v63 = vpop.f32.mrb[81].mxu1  ;;  %v1549_v0 = vadd.f32 %v1548_v62, %v1259_v61  ;;  %v1550_v1 = vpop.f32.mrb[81].mxu0 }
 0x1dd   :  { %v1262_v2 = vpop.f32.mrb[82].mxu1  ;;  %v1551_v3 = vpop.f32.mrb[82].mxu0 }
 0x1de   :  { %v1264_v4 = vpop.f32.mrb[83].mxu1  ;;  %v1552_v5 = vadd.f32 %v1551_v3, %v1262_v2  ;;  %v1553_v6 = vpop.f32.mrb[83].mxu0 }
 0x1e0   :  { %v2372_v7 = vpack.c.bf16 %v1552_v5, %v1549_v0 }
 0x1e2   :  { %2448 = vst [vmem:[#allocation7 + $0xa0] sm:$0xff] %v2372_v7  }
 0x1e3   :  { %v1267_v8 = vpop.f32.mrb[84].mxu1  ;;  %v1556_v9 = vpop.f32.mrb[84].mxu0 }
 0x1e4   :  { %v1269_v10 = vpop.f32.mrb[85].mxu1  ;;  %v1557_v11 = vadd.f32 %v1556_v9, %v1267_v8  ;;  %v1558_v12 = vpop.f32.mrb[85].mxu0 }
 0x1e5   :  { %v1270_v13 = vpop.f32.mrb[86].mxu1  ;;  %v1559_v14 = vpop.f32.mrb[86].mxu0 }
 0x1e6   :  { %v1272_v15 = vpop.f32.mrb[87].mxu1  ;;  %v1560_v16 = vadd.f32 %v1559_v14, %v1270_v13  ;;  %v1561_v17 = vpop.f32.mrb[87].mxu0 }
 0x1e8   :  { %v2377_v18 = vpack.c.bf16 %v1560_v16, %v1557_v11 }
 0x1ea   :  { %2449 = vst [vmem:[#allocation7 + $0xa8] sm:$0xff] %v2377_v18  }
 0x1eb   :  { %v1275_v19 = vpop.f32.mrb[88].mxu1  ;;  %v1564_v20 = vpop.f32.mrb[88].mxu0 }
 0x1ec   :  { %v1277_v21 = vpop.f32.mrb[89].mxu1  ;;  %v1565_v22 = vadd.f32 %v1564_v20, %v1275_v19  ;;  %v1566_v23 = vpop.f32.mrb[89].mxu0 }
 0x1ed   :  { %v1278_v24 = vpop.f32.mrb[90].mxu1  ;;  %v1567_v25 = vpop.f32.mrb[90].mxu0 }
 0x1ee   :  { %v1280_v26 = vpop.f32.mrb[91].mxu1  ;;  %v1568_v27 = vadd.f32 %v1567_v25, %v1278_v24  ;;  %v1569_v28 = vpop.f32.mrb[91].mxu0 }
 0x1f0   :  { %v2382_v29 = vpack.c.bf16 %v1568_v27, %v1565_v22 }
 0x1f2   :  { %2450 = vst [vmem:[#allocation7 + $0xb0] sm:$0xff] %v2382_v29  }
 0x1f3   :  { %v1283_v30 = vpop.f32.mrb[92].mxu1  ;;  %v1572_v31 = vpop.f32.mrb[92].mxu0 }
 0x1f4   :  { %v1285_v32 = vpop.f32.mrb[93].mxu1  ;;  %v1573_v33 = vadd.f32 %v1572_v31, %v1283_v30  ;;  %v1574_v34 = vpop.f32.mrb[93].mxu0 }
 0x1f5   :  { %v1286_v35 = vpop.f32.mrb[94].mxu1  ;;  %v1575_v36 = vpop.f32.mrb[94].mxu0 }
 0x1f6   :  { %v1288_v37 = vpop.f32.mrb[95].mxu1  ;;  %v1576_v38 = vadd.f32 %v1575_v36, %v1286_v35  ;;  %v1577_v39 = vpop.f32.mrb[95].mxu0 }
 0x1f8   :  { %v2387_v40 = vpack.c.bf16 %v1576_v38, %v1573_v33 }
 0x1fa   :  { %2451 = vst [vmem:[#allocation7 + $0xb8] sm:$0xff] %v2387_v40  }
 0x1fb   :  { %v1291_v41 = vpop.f32.mrb[96].mxu1  ;;  %v1580_v42 = vpop.f32.mrb[96].mxu0 }
 0x1fc   :  { %v1293_v43 = vpop.f32.mrb[97].mxu1  ;;  %v1581_v44 = vadd.f32 %v1580_v42, %v1291_v41  ;;  %v1582_v45 = vpop.f32.mrb[97].mxu0 }
 0x1fd   :  { %v1294_v46 = vpop.f32.mrb[98].mxu1  ;;  %v1583_v47 = vpop.f32.mrb[98].mxu0 }
 0x1fe   :  { %v1296_v48 = vpop.f32.mrb[99].mxu1  ;;  %v1584_v49 = vadd.f32 %v1583_v47, %v1294_v46  ;;  %v1585_v50 = vpop.f32.mrb[99].mxu0 }
 0x200   :  { %v2392_v51 = vpack.c.bf16 %v1584_v49, %v1581_v44 }
 0x202   :  { %2452 = vst [vmem:[#allocation7 + $0xc0] sm:$0xff] %v2392_v51  }
 0x203   :  { %v1299_v52 = vpop.f32.mrb[100].mxu1  ;;  %v1588_v53 = vpop.f32.mrb[100].mxu0 }
 0x204   :  { %v1301_v54 = vpop.f32.mrb[101].mxu1  ;;  %v1589_v55 = vadd.f32 %v1588_v53, %v1299_v52  ;;  %v1590_v56 = vpop.f32.mrb[101].mxu0 }
 0x205   :  { %v1302_v57 = vpop.f32.mrb[102].mxu1  ;;  %v1591_v58 = vpop.f32.mrb[102].mxu0 }
 0x206   :  { %v1304_v59 = vpop.f32.mrb[103].mxu1  ;;  %v1592_v60 = vadd.f32 %v1591_v58, %v1302_v57  ;;  %v1593_v61 = vpop.f32.mrb[103].mxu0 }
 0x208   :  { %v2397_v62 = vpack.c.bf16 %v1592_v60, %v1589_v55 }
 0x20a   :  { %2453 = vst [vmem:[#allocation7 + $0xc8] sm:$0xff] %v2397_v62  }
 0x20b   :  { %v1307_v63 = vpop.f32.mrb[104].mxu1  ;;  %v1596_v0 = vpop.f32.mrb[104].mxu0 }
 0x20c   :  { %v1309_v1 = vpop.f32.mrb[105].mxu1  ;;  %v1597_v2 = vadd.f32 %v1596_v0, %v1307_v63  ;;  %v1598_v3 = vpop.f32.mrb[105].mxu0 }
 0x20d   :  { %v1310_v4 = vpop.f32.mrb[106].mxu1  ;;  %v1599_v5 = vpop.f32.mrb[106].mxu0 }
 0x20e   :  { %v1312_v6 = vpop.f32.mrb[107].mxu1  ;;  %v1600_v7 = vadd.f32 %v1599_v5, %v1310_v4  ;;  %v1601_v8 = vpop.f32.mrb[107].mxu0 }
 0x210   :  { %v2402_v9 = vpack.c.bf16 %v1600_v7, %v1597_v2 }
 0x212   :  { %2454 = vst [vmem:[#allocation7 + $0xd0] sm:$0xff] %v2402_v9  }
 0x213   :  { %v1315_v10 = vpop.f32.mrb[108].mxu1  ;;  %v1604_v11 = vpop.f32.mrb[108].mxu0 }
 0x214   :  { %v1317_v12 = vpop.f32.mrb[109].mxu1  ;;  %v1605_v13 = vadd.f32 %v1604_v11, %v1315_v10  ;;  %v1606_v14 = vpop.f32.mrb[109].mxu0 }
 0x215   :  { %v1318_v15 = vpop.f32.mrb[110].mxu1  ;;  %v1607_v16 = vpop.f32.mrb[110].mxu0 }
 0x216   :  { %v1320_v17 = vpop.f32.mrb[111].mxu1  ;;  %v1608_v18 = vadd.f32 %v1607_v16, %v1318_v15  ;;  %v1609_v19 = vpop.f32.mrb[111].mxu0 }
 0x218   :  { %v2407_v20 = vpack.c.bf16 %v1608_v18, %v1605_v13 }
 0x21a   :  { %2455 = vst [vmem:[#allocation7 + $0xd8] sm:$0xff] %v2407_v20  }
 0x21b   :  { %v1323_v21 = vpop.f32.mrb[112].mxu1  ;;  %v1612_v22 = vpop.f32.mrb[112].mxu0 }
 0x21c   :  { %v1325_v23 = vpop.f32.mrb[113].mxu1  ;;  %v1613_v24 = vadd.f32 %v1612_v22, %v1323_v21  ;;  %v1614_v25 = vpop.f32.mrb[113].mxu0 }
 0x21d   :  { %v1326_v26 = vpop.f32.mrb[114].mxu1  ;;  %v1615_v27 = vpop.f32.mrb[114].mxu0 }
 0x21e   :  { %v1328_v28 = vpop.f32.mrb[115].mxu1  ;;  %v1616_v29 = vadd.f32 %v1615_v27, %v1326_v26  ;;  %v1617_v30 = vpop.f32.mrb[115].mxu0 }
 0x220   :  { %v2412_v31 = vpack.c.bf16 %v1616_v29, %v1613_v24 }
 0x222   :  { %2456 = vst [vmem:[#allocation7 + $0xe0] sm:$0xff] %v2412_v31  }
 0x223   :  { %v1331_v32 = vpop.f32.mrb[116].mxu1  ;;  %v1620_v33 = vpop.f32.mrb[116].mxu0 }
 0x224   :  { %v1333_v34 = vpop.f32.mrb[117].mxu1  ;;  %v1621_v35 = vadd.f32 %v1620_v33, %v1331_v32  ;;  %v1622_v36 = vpop.f32.mrb[117].mxu0 }
 0x225   :  { %v1334_v37 = vpop.f32.mrb[118].mxu1  ;;  %v1623_v38 = vpop.f32.mrb[118].mxu0 }
 0x226   :  { %v1336_v39 = vpop.f32.mrb[119].mxu1  ;;  %v1624_v40 = vadd.f32 %v1623_v38, %v1334_v37  ;;  %v1625_v41 = vpop.f32.mrb[119].mxu0 }
 0x228   :  { %v2417_v42 = vpack.c.bf16 %v1624_v40, %v1621_v35 }
 0x22a   :  { %2457 = vst [vmem:[#allocation7 + $0xe8] sm:$0xff] %v2417_v42  }
 0x22b   :  { %v1339_v43 = vpop.f32.mrb[120].mxu1  ;;  %v1628_v44 = vpop.f32.mrb[120].mxu0 }
 0x22c   :  { %v1341_v45 = vpop.f32.mrb[121].mxu1  ;;  %v1629_v46 = vadd.f32 %v1628_v44, %v1339_v43  ;;  %v1630_v47 = vpop.f32.mrb[121].mxu0 }
 0x22d   :  { %v1342_v48 = vpop.f32.mrb[122].mxu1  ;;  %v1631_v49 = vpop.f32.mrb[122].mxu0 }
 0x22e   :  { %v1344_v50 = vpop.f32.mrb[123].mxu1  ;;  %v1632_v51 = vadd.f32 %v1631_v49, %v1342_v48  ;;  %v1633_v52 = vpop.f32.mrb[123].mxu0 }
 0x230   :  { %v2422_v53 = vpack.c.bf16 %v1632_v51, %v1629_v46 }
 0x232   :  { %2458 = vst [vmem:[#allocation7 + $0xf0] sm:$0xff] %v2422_v53  }
 0x233   :  { %v1347_v54 = vpop.f32.mrb[124].mxu1  ;;  %v1636_v55 = vpop.f32.mrb[124].mxu0 }
 0x234   :  { %v1349_v56 = vpop.f32.mrb[125].mxu1  ;;  %v1637_v57 = vadd.f32 %v1636_v55, %v1347_v54  ;;  %v1638_v58 = vpop.f32.mrb[125].mxu0 }
 0x235   :  { %v1350_v59 = vpop.f32.mrb[126].mxu1  ;;  %v1639_v60 = vpop.f32.mrb[126].mxu0 }
 0x236   :  { %v1352_v61 = vpop.f32.mrb[127].mxu1  ;;  %v1640_v62 = vadd.f32 %v1639_v60, %v1350_v59  ;;  %v1641_v63 = vpop.f32.mrb[127].mxu0 }
 0x238   :  { %v2427_v0 = vpack.c.bf16 %v1640_v62, %v1637_v57 }
 0x23a   :  { %2459 = vst [vmem:[#allocation7 + $0xf8] sm:$0xff] %v2427_v0  }
 0x23b   :  { %2811 = shalt.err (!%p2808_p6)
}
 0x23c   :  { %s2812_s12 = scalar_lea.hbm %s2927_s2, 4096 }
 0x23d   :  { %p2813_p7 = scmp.ne.s32.totalorder %s2927_s2, %s2812_s12  ;;  %p2816_p8 = scmp.lt.u32.totalorder %s2812_s12, %s2927_s2 }
 0x23f   :  { %p2818_p9 = pnand %p2816_p8, %p2813_p7 }
 0x241   :  { %2821 = shalt.err (!%p2818_p9)
}
 0x242   :  { %1974 = dma.vmem_to_hbm [thread:$0]  %s1969_s8, 4096, %s2927_s2, [#allocation4], %s2832_s0, %s2832_s0, %s2833_s5  }
 0x243   :  { %2826 = dma.done.wait [#allocation4], 4096  }
 0x244   :  { %2827 = vsyncadd [#allocation4], 4294963200 }
 0x245   :  { %1978 = vsyncpa [#allocation3], 1 }
 0x246   :  { %1979 = vsyncpa [#allocation6], 1 }
 0x247   :  { %1980 = vsyncpa [#allocation4], 1 }

</bundles_post_ra>
